<compile_context>
chip_gen: v7x
topology: tpu7x:2x2x1
jax: 0.10.0
libtpu: 0.0.40
codegen_flags: <defaults>
</compile_context>

<pallas_src>
import jax
import jax.numpy as jnp
from jax.experimental import pallas as pl
from jax.experimental.pallas import tpu as pltpu


def _square_kernel(a_ref, o_ref):
    # Elementwise square of the current VMEM tile (single VPU multiply).
    x = a_ref[...]
    o_ref[...] = x * x


_LANE = 128
_SPLIT_THRESHOLD_BYTES = 2 * 1024 * 1024  # below this, one block is fine


def _sublane_multiple(itemsize: int) -> int:
    # 32-bit -> 8 sublanes, 16-bit -> 16, 8-bit -> 32 (sub-32-bit packing).
    return max(8, 32 // itemsize)


def elementwise_pow2(
    a: jax.Array,
    *,
    # ~8 MiB blocks: comfortably past the per-grid-step overhead knee on all
    # generations; 4 pipelined buffers (2 in + 2 out) = 32 MiB.
    target_block_bytes: int = 8 * 1024 * 1024,
    # 48 MiB scoped VMEM: headroom over the 32 MiB of buffers, still safely
    # under v7x's 64 MiB physical VMEM (and trivially under v5e/v6e's 128 MiB).
    vmem_limit_bytes: int = 48 * 1024 * 1024,
) -> jax.Array:
    """Pallas TPU implementation of torch.pow(a, 2.0) for a 2-D array."""
    assert a.ndim == 2, "module is annotated for rank-2 inputs"
    M, N = a.shape
    itemsize = jnp.dtype(a.dtype).itemsize
    sub = _sublane_multiple(itemsize)

    # ---- Layout: lane-dense slab when the last dim is not 128-aligned. ----
    # Reshape (M, N) -> (M*N/L, L) with L a multiple of 128 when possible; this
    # is a free row-major reshape and turns masked vst.msk partial stores and
    # padded-lane DMAs into full-width ones.  Fall back to the original shape
    # when M*N has no multiple-of-128 factorization.
    work = a
    if N % _LANE != 0:
        total = M * N
        for L in (64 * _LANE, 32 * _LANE, 16 * _LANE, 8 * _LANE,
                  4 * _LANE, 2 * _LANE, _LANE):
            if L <= total and total % L == 0:
                work = a.reshape(total // L, L)
                break
    Mw, Nw = work.shape
    row_bytes = Nw * itemsize

    # Per-block byte budget: requested block size, but never more than a
    # quarter of the VMEM limit (double-buffered input + output blocks).
    block_budget = max(
        sub * _LANE * itemsize,
        min(target_block_bytes, vmem_limit_bytes // 4),
    )

    if sub * row_bytes > block_budget:
        # Degenerate very-wide rows: even a minimum-height full-width block
        # would blow the VMEM budget.  Tile the lane dimension too (multiples
        # of 128 keep DMAs lane-dense and stores unmasked) with a 2-D grid.
        tn = max(_LANE, (block_budget // (sub * itemsize)) // _LANE * _LANE)
        tn = min(tn, Nw)
        tm = max(sub, (block_budget // (tn * itemsize)) // sub * sub)
        if tm >= Mw:
            tm = Mw
    else:
        # Normal path: full-width rows, tile only the row dimension.
        tn = Nw
        tm = max(sub, (block_budget // row_bytes) // sub * sub)
        if tm >= Mw:
            block_bytes = Mw * row_bytes
            if Mw > sub and block_bytes > _SPLIT_THRESHOLD_BYTES:
                # Keep >= 2 grid steps: enables DMA/compute overlap and lets
                # v7x shard the parallel axis across its two TensorCores.
                half = (Mw + 1) // 2
                tm = max(sub, (half // sub) * sub)
                if tm >= Mw:
                    tm = Mw
            else:
                tm = Mw  # tiny array: single full-extent block, zero overhead

    grid = (pl.cdiv(Mw, tm), pl.cdiv(Nw, tn))

    # Advisory cost: 1 mul/elem, read + write of the whole array.
    cost = pl.CostEstimate(
        flops=M * N,
        transcendentals=0,
        bytes_accessed=2 * M * N * itemsize,
    )

    out = pl.pallas_call(
        _square_kernel,
        out_shape=jax.ShapeDtypeStruct((Mw, Nw), a.dtype),
        grid_spec=pltpu.PrefetchScalarGridSpec(
            num_scalar_prefetch=0,
            grid=grid,
            in_specs=[pl.BlockSpec((tm, tn), lambda i, j: (i, j))],
            out_specs=pl.BlockSpec((tm, tn), lambda i, j: (i, j)),
        ),
        compiler_params=pltpu.CompilerParams(
            # Both axes are embarrassingly parallel (elementwise op).
            dimension_semantics=("parallel", "parallel"),
            vmem_limit_bytes=vmem_limit_bytes,
        ),
        cost_estimate=cost,
    )(work)

    if out.shape != (M, N):
        out = out.reshape(M, N)
    return out


if __name__ == "__main__":
    key = jax.random.PRNGKey(0)

    # Test 1: small ([-1,-1], float32) input; N=32 is not 128-aligned, so the
    # wrapper reshapes to a lane-dense (2, 128)-style slab (single block).
    a_small = jax.random.normal(key, (8, 32), dtype=jnp.float32)
    out_small = jax.block_until_ready(elementwise_pow2(a_small))
    ref_small = a_small * a_small
    assert out_small.shape == ref_small.shape and out_small.dtype == ref_small.dtype
    assert jnp.allclose(out_small, ref_small, atol=1e-6, rtol=1e-6)

    # Test 2: tiled row path with a ragged last block (reshaped to (297, 128),
    # three 128-row blocks) by forcing a small block-byte budget.
    a_tiled = jax.random.normal(jax.random.PRNGKey(1), (264, 144), dtype=jnp.float32)
    out_tiled = jax.block_until_ready(
        elementwise_pow2(a_tiled, target_block_bytes=64 * 1024)
    )
    assert jnp.allclose(out_tiled, a_tiled * a_tiled, atol=1e-6, rtol=1e-6)

    # Test 3: lane-tiled 2-D grid path (wide rows vs. a tiny block budget):
    # grid (2, 2) with (8, 1024) blocks.
    a_wide = jax.random.normal(jax.random.PRNGKey(2), (16, 2048), dtype=jnp.float32)
    out_wide = jax.block_until_ready(
        elementwise_pow2(a_wide, target_block_bytes=32 * 1024)
    )
    assert jnp.allclose(out_wide, a_wide * a_wide, atol=1e-6, rtol=1e-6)

    # Test 4: mid-size array that would otherwise be a single block; the
    # wrapper splits it into >= 2 grid steps (320-row blocks, grid (2, 1)).
    a_mid = jax.random.normal(jax.random.PRNGKey(3), (640, 1024), dtype=jnp.float32)
    out_mid = jax.block_until_ready(elementwise_pow2(a_mid))
    assert jnp.allclose(out_mid, a_mid * a_mid, atol=1e-6, rtol=1e-6)

    print("KERNEL_OK")
</pallas_src>

<mosaic_0001>
module attributes {stable_mosaic.version = 11 : i64} {
  func.func @_square_kernel(%arg0: i32, %arg1: i32, %arg2: memref<1x256xf32, #tpu.memory_space<vmem>>, %arg3: memref<1x256xf32, #tpu.memory_space<vmem>>) attributes {dimension_semantics = [#tpu.dimension_semantics<parallel>, #tpu.dimension_semantics<parallel>], iteration_bounds = array<i64: 1, 1>, scalar_prefetch = 0 : i64, scratch_operands = 0 : i64, tpu.core_type = #tpu.core_type<tc>, window_params = [{transform_indices = @transform_0, window_bounds = array<i64: 1, 256>}, {transform_indices = @transform_1, window_bounds = array<i64: 1, 256>}]} {
    %c0 = arith.constant 0 : index
    %c0_0 = arith.constant 0 : index
    %0 = vector.load %arg2[%c0, %c0_0] : memref<1x256xf32, #tpu.memory_space<vmem>>, vector<1x256xf32>
    %1 = arith.mulf %0, %0 : vector<1x256xf32>
    %c0_1 = arith.constant 0 : index
    %c0_2 = arith.constant 0 : index
    %2 = vector.load %arg3[%c0_1, %c0_2] : memref<1x256xf32, #tpu.memory_space<vmem>>, vector<1x256xf32>
    tpu.vector_store %arg3[%c0_1, %c0_2], %1 {strides = array<i32>} : memref<1x256xf32, #tpu.memory_space<vmem>>, vector<1x256xf32>,
    return
  }
  func.func @transform_0(%arg0: i32, %arg1: i32) -> (i32, i32) {
    %c0_i32 = arith.constant 0 : i32
    return %arg0, %arg1 : i32, i32
  }
  func.func @transform_1(%arg0: i32, %arg1: i32) -> (i32, i32) {
    %c0_i32 = arith.constant 0 : i32
    return %arg0, %arg1 : i32, i32
  }
}

</mosaic_0001>

<bundles_post_ra>
// kernel: tpu_custom_call.1
= control target key start
LH: loop header
LB: loop body
LE: loop exit
PB: predicated region body
PF: predicated region fallthrough
CT: control target
= control target key end

     0   :  { %6 = vsyncpa [#allocation3], 0  ;;  %s129_s0 = inlined_call_operand.hbm [shape: f32[1,256], index: 0, kind: input, shape index: {}]   ;;  %s130_s1 = inlined_call_operand.hbm [shape: f32[1,256], index: 1, kind: output, shape index: {}]  }
   0x1   :  { %7 = vsyncpa [#allocation4], 0  ;;  %s93_s6 = smov [#allocation2]   ;;  %s45_s10 = scalar_lea.hbm %s129_s0, 32 }
   0x2   :  { %s14_s7 = sshll.u32 %s93_s6, 4  ;;  %p46_p0 = scmp.ne.s32.totalorder %s129_s0, %s45_s10  ;;  %s15_s7 = int_to_ptr.vmem [resolvable:$true] %s14_s7 }
   0x3   :  { %p49_p1 = scmp.lt.u32.totalorder %s45_s10, %s129_s0 }
   0x5   :  { %p51_p2 = pnand %p49_p1, %p46_p0 }
   0x7   :  { %54 = shalt.err (!%p51_p2)
}
   0x8   :  { %s55_s15 = scalar_lea.vmem %s15_s7, 32  ;;  %p60_p4 = scmp.lt.s32.totalorder %s15_s7, %s15_s7 }
   0x9   :  { %p56_p3 = scmp.ne.s32.totalorder %s15_s7, %s55_s15  ;;  %p61_p5 = scmp.lt.s32.totalorder %s55_s15, %s55_s15 }
   0xb   :  { %p62_p6 = por %p61_p5, %p60_p4 }
   0xd   :  { %p63_p7 = pnand %p62_p6, %p56_p3 }
   0xf   :  { %66 = shalt.err (!%p63_p7)
}
  0x10   :  { %17 = dma.hbm_to_vmem [thread:$0]  %s129_s0, 32, %s15_s7, [#allocation3]  }
  0x11   :  { %89 = dma.done.wait [#allocation3], 32  }
  0x12   :  { %90 = vsyncadd [#allocation3], 4294967264  ;;  %v23_v0 = vlaneseq  ;;  %s94_s18 = smov [#allocation5]   ;;  %v21_v1 = vld [vmem:[#allocation2] sm:$0x3] }
  0x13   :  { %s34_s19 = sshll.u32 %s94_s18, 4  ;;  %v22_v2 = vmul.f32 %v21_v1, %v21_v1  ;;  %s35_s19 = int_to_ptr.vmem [resolvable:$true] %s34_s19 }
  0x14   :  { %vm25_vm0 = vcmp.lt.s32.totalorder %v23_v0, 256  ;;  %s67_s20 = scalar_lea.vmem %s35_s19, 32  ;;  %p72_p9 = scmp.lt.s32.totalorder %s35_s19, %s35_s19 }
  0x15   :  { %27 = vst.msk [vmem:[#allocation5] sm:$0x3] %vm25_vm0, %v22_v2  ;;  %p68_p8 = scmp.ne.s32.totalorder %s35_s19, %s67_s20  ;;  %p73_p10 = scmp.lt.s32.totalorder %s67_s20, %s67_s20 }
  0x17   :  { %p74_p11 = por %p73_p10, %p72_p9 }
  0x19   :  { %p75_p12 = pnand %p74_p11, %p68_p8 }
  0x1b   :  { %78 = shalt.err (!%p75_p12)
}
  0x1c   :  { %s79_s0 = scalar_lea.hbm %s130_s1, 32 }
  0x1d   :  { %p80_p13 = scmp.ne.s32.totalorder %s130_s1, %s79_s0  ;;  %p83_p0 = scmp.lt.u32.totalorder %s79_s0, %s130_s1 }
  0x1f   :  { %p85_p1 = pnand %p83_p0, %p80_p13 }
  0x21   :  { %88 = shalt.err (!%p85_p1)
}
  0x22   :  { %37 = dma.vmem_to_hbm [thread:$0]  %s35_s19, 32, %s130_s1, [#allocation4]  }
  0x23   :  { %91 = dma.done.wait [#allocation4], 32  }
  0x24   :  { %92 = vsyncadd [#allocation4], 4294967264 }
  0x25   :  { %41 = vsyncpa [#allocation3], 1 }
  0x26   :  { %42 = vsyncpa [#allocation4], 1 }

</bundles_post_ra>
